<compile_context>
chip_gen: v5e
topology: v5e:2x2
jax: 0.10.0
libtpu: 0.0.40
codegen_flags: <defaults>
</compile_context>

<pallas_src>
import numpy as np
import jax
import jax.numpy as jnp
from jax.experimental import pallas as pl
from jax.experimental.pallas import tpu as pltpu


_LANE = 128                      # lane width: output last dim padded to a multiple of this
_MAX_PLANE_BLOCK = 32            # max (N*C) planes per grid step
_VMEM_BLOCK_BUDGET = 28 << 20    # per-step working-set target; safe for v7x's 64 MiB VMEM


def _bilinear_aa_weight_matrix(in_size: int, out_size: int) -> np.ndarray:
    """Separable antialiased bilinear resampling weights (PIL/torchvision style).

    scale = in/out, filterscale = max(scale, 1), center_j = (j+0.5)*scale,
    w(x) = max(0, 1 - |(x - center_j + 0.5)/filterscale|), row-normalized.
    Returns a dense (out_size, in_size) float32 matrix.
    """
    scale = in_size / out_size
    filterscale = max(scale, 1.0)
    support = filterscale  # bilinear support = 1.0, widened when downsampling
    W = np.zeros((out_size, in_size), dtype=np.float64)
    for j in range(out_size):
        center = (j + 0.5) * scale
        xmin = int(max(center - support + 0.5, 0.0))
        xmax = int(min(center + support + 0.5, float(in_size)))
        xs = np.arange(xmin, xmax, dtype=np.float64)
        w = 1.0 - np.abs((xs - center + 0.5) / filterscale)
        w = np.clip(w, 0.0, None)
        s = w.sum()
        if s > 0.0:
            w /= s
        W[j, xmin:xmax] = w
    return W.astype(np.float32)


def _output_size(size, in_h: int, in_w: int):
    """torchvision semantics: int -> resize smaller edge, tuple -> exact size."""
    # Note: tie cases of the rounded long edge can differ from torchvision by 1px.
    if isinstance(size, (tuple, list)):
        return int(size[0]), int(size[1])
    if in_h <= in_w:
        return int(size), int(round(size * in_w / in_h))
    return int(round(size * in_h / in_w)), int(size)


def _make_resize_kernel(B, H, W, out_h, Wp, horizontal_first, out_dtype, compute_dtype):
    out_is_int = jnp.issubdtype(jnp.dtype(out_dtype), jnp.integer)

    def kernel(x_ref, wv_ref, wh_ref, o_ref):
        # x_ref: (B, H, W) planes; wv_ref: (out_h, H); wh_ref: (W, Wp); o_ref: (B, out_h, Wp)
        xf = x_ref[...].astype(jnp.float32)
        wv = wv_ref[...].astype(compute_dtype)
        wh = wh_ref[...].astype(compute_dtype)

        def vertical(v):
            # v: (B, H, cols) f32 -> (B, out_h, cols) f32 accumulate, batched over B.
            wv_b = jnp.broadcast_to(wv, (B,) + wv.shape)
            return jax.lax.dot_general(
                wv_b, v.astype(compute_dtype),
                (((2,), (1,)), ((0,), (0,))),
                preferred_element_type=jnp.float32)

        def horizontal(v, rows):
            # v: (B, rows, W) f32 -> (B, rows, Wp) f32 accumulate.
            if rows % 8 == 0:
                # Layout-free flatten (f32 sublane tile = 8): one big MXU matmul.
                y = jnp.dot(v.reshape(B * rows, W).astype(compute_dtype), wh,
                            preferred_element_type=jnp.float32)
                return y.reshape(B, rows, Wp)
            wh_b = jnp.broadcast_to(wh, (B,) + wh.shape)
            return jax.lax.dot_general(
                v.astype(compute_dtype), wh_b,
                (((2,), (1,)), ((0,), (0,))),
                preferred_element_type=jnp.float32)

        if horizontal_first:
            y = vertical(horizontal(xf, H))          # (B, out_h, Wp)
        else:
            y = horizontal(vertical(xf), out_h)      # (B, out_h, Wp)

        if out_is_int:
            info = jnp.iinfo(jnp.dtype(out_dtype))
            y = jnp.clip(jnp.rint(y), info.min, info.max)
        o_ref[...] = y.astype(o_ref.dtype)

    return kernel


def resize_bilinear_antialias(img, size, compute_dtype=jnp.bfloat16):
    """img: (N, C, H, W) array -> (N, C, out_h, out_w), antialiased bilinear."""
    N, C, H, W = img.shape
    out_h, out_w = _output_size(size, H, W)
    out_dtype = img.dtype

    # Resampling weights (f32 in HBM; cast to bf16 inside the kernel).
    wv_np = _bilinear_aa_weight_matrix(H, out_h)        # (out_h, H)
    wh_np = _bilinear_aa_weight_matrix(W, out_w).T      # (W, out_w)

    # Lane-dense output: pad out_w up to a multiple of 128 with zero columns.
    Wp = ((out_w + _LANE - 1) // _LANE) * _LANE
    wh_pad = np.zeros((W, Wp), dtype=np.float32)
    wh_pad[:, :out_w] = wh_np

    # Contraction order: apply the axis with the larger shrink first.
    flops_h_first = H * Wp * (W + out_h)
    flops_v_first = out_h * W * (H + Wp)
    horizontal_first = flops_h_first <= flops_v_first

    in_isz = img.dtype.itemsize
    out_isz = jnp.dtype(out_dtype).itemsize

    # ---- pick how many planes to process per grid step (VMEM budgeted) ----
    P = N * C
    inter = max(H * Wp, out_h * W)
    bytes_per_plane = (
        2 * H * W * in_isz            # double-buffered input block
        + 2 * out_h * Wp * out_isz    # double-buffered output block
        + 4 * H * W                   # f32 copy of the input block
        + 6 * inter                   # f32 + bf16 intermediate
        + 4 * out_h * Wp              # f32 accumulator of the second pass
        + 2 * out_h * H               # broadcast vertical weights (bf16)
    )
    flat_rows = H if horizontal_first else out_h
    if flat_rows % 8 != 0:            # fallback pass broadcasts wh per plane
        bytes_per_plane += 2 * W * Wp
    fixed_bytes = 2 * 4 * (out_h * H + W * Wp) + (1 << 20)  # weights (double-buffered) + slack
    B = int(max(1, min(_MAX_PLANE_BLOCK, P,
                       (_VMEM_BLOCK_BUDGET - fixed_bytes) // max(bytes_per_plane, 1))))
    if P > 1:
        B = min(B, -(-P // 2))        # keep >= 2 grid steps for megacore sharding

    n_blocks = -(-P // B)
    P_pad = n_blocks * B

    x = img.reshape(P, H, W)
    if P_pad != P:
        x = jnp.pad(x, ((0, P_pad - P), (0, 0), (0, 0)))

    wv = jnp.asarray(wv_np)
    wh = jnp.asarray(wh_pad)

    kernel = _make_resize_kernel(B, H, W, out_h, Wp, horizontal_first,
                                 out_dtype, compute_dtype)

    flops = 2 * P_pad * min(flops_h_first, flops_v_first)
    bytes_accessed = (P_pad * H * W * in_isz + P_pad * out_h * Wp * out_isz
                      + wv.size * 4 + wh.size * 4)
    vmem_limit = int(min(64 << 20,
                         max(32 << 20, 2 * (B * bytes_per_plane + fixed_bytes))))

    out = pl.pallas_call(
        kernel,
        out_shape=jax.ShapeDtypeStruct((P_pad, out_h, Wp), out_dtype),
        grid_spec=pltpu.PrefetchScalarGridSpec(
            num_scalar_prefetch=0,
            grid=(n_blocks,),
            in_specs=[
                pl.BlockSpec((B, H, W), lambda i: (i, 0, 0)),
                # Grid-invariant weights: constant index_map -> DMA'd once.
                pl.BlockSpec((out_h, H), lambda i: (0, 0)),
                pl.BlockSpec((W, Wp), lambda i: (0, 0)),
            ],
            out_specs=pl.BlockSpec((B, out_h, Wp), lambda i: (i, 0, 0)),
        ),
        compiler_params=pltpu.CompilerParams(
            dimension_semantics=("parallel",),
            vmem_limit_bytes=vmem_limit,
        ),
        cost_estimate=pl.CostEstimate(
            flops=int(flops), transcendentals=0, bytes_accessed=int(bytes_accessed)),
    )(x, wv, wh)

    # Drop plane padding and lane padding; restore NCHW.
    return out[:P, :, :out_w].reshape(N, C, out_h, out_w)


class Resizer:
    """JAX/Pallas mirror of the PyTorch `Resizer` module."""

    def __init__(self, size):
        self.size = size
        self._fn = jax.jit(lambda img: resize_bilinear_antialias(img, self.size))

    def __call__(self, img):
        return self._fn(img)


if __name__ == "__main__":
    key = jax.random.PRNGKey(0)
    # NCHW input, like PyTorch: batch=2, channels=4, spatial=16x16.
    x = jax.random.uniform(key, (2, 4, 16, 16), dtype=jnp.float32)

    resizer = Resizer(size=(8, 12))   # downsample -> antialias kernel widening active
    y = resizer(x)
    jax.block_until_ready(y)

    assert y.shape == (2, 4, 8, 12), y.shape
    assert y.dtype == x.dtype

    # Pure-JAX/numpy reference (f32 dense separable resample); bf16 MXU path
    # is expected to agree within ~1e-2 absolute.
    wv_ref = _bilinear_aa_weight_matrix(16, 8)      # (8, 16)
    ww_ref = _bilinear_aa_weight_matrix(16, 12)     # (12, 16)
    ref = np.einsum("oh,nchw,qw->ncoq", wv_ref, np.asarray(x, np.float32), ww_ref)
    np.testing.assert_allclose(np.asarray(y), ref, atol=3e-2, rtol=0)

    print("KERNEL_OK")
</pallas_src>

<mosaic_0001>
module attributes {stable_mosaic.version = 11 : i64} {
  func.func @kernel(%arg0: i32, %arg1: memref<4x16x16xf32, #tpu.memory_space<vmem>>, %arg2: memref<8x16xf32, #tpu.memory_space<vmem>>, %arg3: memref<16x128xf32, #tpu.memory_space<vmem>>, %arg4: memref<4x8x128xf32, #tpu.memory_space<vmem>>) attributes {dimension_semantics = [#tpu.dimension_semantics<parallel>], iteration_bounds = array<i64: 2>, scalar_prefetch = 0 : i64, scratch_operands = 0 : i64, tpu.core_type = #tpu.core_type<tc>, window_params = [{transform_indices = @transform_0, window_bounds = array<i64: 4, 16, 16>}, {pipeline_mode = #tpu.pipeline_mode<synchronous>, transform_indices = @transform_1, window_bounds = array<i64: 8, 16>}, {pipeline_mode = #tpu.pipeline_mode<synchronous>, transform_indices = @transform_2, window_bounds = array<i64: 16, 128>}, {transform_indices = @transform_3, window_bounds = array<i64: 4, 8, 128>}]} {
    %c0 = arith.constant 0 : index
    %c0_0 = arith.constant 0 : index
    %c0_1 = arith.constant 0 : index
    %0 = vector.load %arg1[%c0, %c0_0, %c0_1] : memref<4x16x16xf32, #tpu.memory_space<vmem>>, vector<4x16x16xf32>
    %c0_2 = arith.constant 0 : index
    %c0_3 = arith.constant 0 : index
    %1 = vector.load %arg2[%c0_2, %c0_3] : memref<8x16xf32, #tpu.memory_space<vmem>>, vector<8x16xf32>
    %2 = arith.truncf %1 : vector<8x16xf32> to vector<8x16xbf16>
    %c0_4 = arith.constant 0 : index
    %c0_5 = arith.constant 0 : index
    %3 = vector.load %arg3[%c0_4, %c0_5] : memref<16x128xf32, #tpu.memory_space<vmem>>, vector<16x128xf32>
    %4 = arith.truncf %3 : vector<16x128xf32> to vector<16x128xbf16>
    %5 = vector.shape_cast %2 : vector<8x16xbf16> to vector<1x8x16xbf16>
    %6 = vector.broadcast %5 : vector<1x8x16xbf16> to vector<4x8x16xbf16>
    %7 = arith.truncf %0 : vector<4x16x16xf32> to vector<4x16x16xbf16>
    %cst = arith.constant dense<0.000000e+00> : vector<4x8x16xf32>
    %8 = tpu.matmul %6, %7, %cst {dimension_numbers = #tpu.dot_dimension_numbers<[2], [1], [1], [2], [0, 0, 0, 1, 1, 2], [0], [0]>} : vector<4x8x16xbf16>, vector<4x16x16xbf16>, vector<4x8x16xf32> -> vector<4x8x16xf32>
    %9 = vector.shape_cast %8 : vector<4x8x16xf32> to vector<32x16xf32>
    %10 = arith.truncf %9 : vector<32x16xf32> to vector<32x16xbf16>
    %cst_6 = arith.constant dense<0.000000e+00> : vector<32x128xf32>
    %11 = tpu.matmul %10, %4, %cst_6 {dimension_numbers = #tpu.dot_dimension_numbers<[1], [0], [0], [1], [0, 0, 1, 1], [], []>} : vector<32x16xbf16>, vector<16x128xbf16>, vector<32x128xf32> -> vector<32x128xf32>
    %12 = vector.shape_cast %11 : vector<32x128xf32> to vector<4x8x128xf32>
    %c0_7 = arith.constant 0 : index
    %c0_8 = arith.constant 0 : index
    %c0_9 = arith.constant 0 : index
    %13 = vector.load %arg4[%c0_7, %c0_8, %c0_9] : memref<4x8x128xf32, #tpu.memory_space<vmem>>, vector<4x8x128xf32>
    tpu.vector_store %arg4[%c0_7, %c0_8, %c0_9], %12 {strides = array<i32>} : memref<4x8x128xf32, #tpu.memory_space<vmem>>, vector<4x8x128xf32>,
    return
  }
  func.func @transform_0(%arg0: i32) -> (i32, i32, i32) {
    %c0_i32 = arith.constant 0 : i32
    %c0_i32_0 = arith.constant 0 : i32
    %c0_i32_1 = arith.constant 0 : i32
    return %arg0, %c0_i32, %c0_i32_0 : i32, i32, i32
  }
  func.func @transform_1(%arg0: i32) -> (i32, i32) {
    %c0_i32 = arith.constant 0 : i32
    %c0_i32_0 = arith.constant 0 : i32
    %c0_i32_1 = arith.constant 0 : i32
    return %c0_i32, %c0_i32_0 : i32, i32
  }
  func.func @transform_2(%arg0: i32) -> (i32, i32) {
    %c0_i32 = arith.constant 0 : i32
    %c0_i32_0 = arith.constant 0 : i32
    %c0_i32_1 = arith.constant 0 : i32
    return %c0_i32, %c0_i32_0 : i32, i32
  }
  func.func @transform_3(%arg0: i32) -> (i32, i32, i32) {
    %c0_i32 = arith.constant 0 : i32
    %c0_i32_0 = arith.constant 0 : i32
    %c0_i32_1 = arith.constant 0 : i32
    return %arg0, %c0_i32, %c0_i32_0 : i32, i32, i32
  }
}

</mosaic_0001>

<bundles_post_ra>
// kernel: _lambda_.1
= control target key start
LH: loop header
LB: loop body
LE: loop exit
PB: predicated region body
PF: predicated region fallthrough
CT: control target
= control target key end

     0   :  { %s905_s0 = inlined_call_operand.hbm [shape: f32[8,16,16], index: 0, kind: input, shape index: {}]   ;;  %s906_s1 = inlined_call_operand.hbm [shape: f32[8,16], index: 1, kind: input, shape index: {}]   ;;  %s907_s2 = inlined_call_operand.hbm [shape: f32[16,128], index: 2, kind: input, shape index: {}]   ;;  %s908_s3 = inlined_call_operand.hbm [shape: f32[8,8,128], index: 3, kind: output, shape index: {}]  }
   0x1   :  { %909 = sst [smem:[#allocation12_spill]] %s906_s1 }
   0x2   :  { %910 = sst [smem:[#allocation13_spill]] %s907_s2 }
   0x3   :  { %8 = vsyncpa [#allocation3], 0 }
   0x4   :  { %10 = vsyncpa [#allocation3 + $0x1], 0 }
   0x5   :  { %11 = vsyncpa [#allocation6], 0 }
   0x6   :  { %12 = vsyncpa [#allocation4], 0 }
   0x7   :  { %14 = vsyncpa [#allocation4 + $0x1], 0  ;;  %s753_s12 = smov 0   ;;  %s755_s13 = smov 0  }
   0x8   :  { %s757_s14 = smov 0   ;;  %s759_s15 = smov 0  }
   0x9 LB: > { %s774_s16 = sadd.s32 4294967295, %s725_s15   ;;  %s466_s17 = sadd.s32 4294967294, %s725_s15   ;;  %s725_s15 = sphi %s759_s15, %s923_s15   ;;  %s721_s14 = sphi %s757_s14, %s922_s14   ;;  %s717_s13 = sphi %s755_s13, %s921_s13   ;;  %s713_s12 = sphi %s753_s12, %s920_s12  }
   0xa   : > { %s778_s18 = sadd.s32 1, %s725_s15   ;;  %s27_s19 = sadd.s32 1, %s721_s14 }
   0xb   : > { %s24_s20 = ssub.s32 %s725_s15, %s778_s18  ;;  %p34_p0 = scmp.ne.s32.totalorder %s721_s14, %s717_s13 }
   0xc   : > { %p25_p1 = scmp.eq.s32.totalorder %s24_s20, 0  ;;  %p35_p2 = scmp.eq.s32.totalorder %s725_s15, 0 }
   0xd   : > { %p40_p3 = scmp.ne.s32.totalorder %s717_s13, %s713_s12  ;;  %p41_p4 = scmp.eq.s32.totalorder %s774_s16, 0 }
   0xe   : > { %s790_s21 = scalar_select %p25_p1, %s721_s14, %s27_s19  }
   0xf   : > { %p792_p5 = por %p35_p2, %p34_p0  ;;  %p798_p6 = por %p41_p4, %p40_p3 }
  0x10   : > { %p106_p7 = scmp.eq.s32.totalorder %s774_s16, 1  ;;  %p112_p8 = scmp.eq.s32.totalorder %s466_s17, 1 }
  0x11   : > { %p467_p9 = scmp.ge.s32.totalorder %s725_s15, 1  ;;  %p119_p10 = scmp.lt.s32.totalorder %s725_s15, 3 }
  0x12   : > { %p805_p11 = por %p106_p7, %p34_p0  ;;  %p809_p12 = por %p112_p8, %p40_p3 }
  0x13   : > { %p813_p13 = pnand %p467_p9, %p119_p10  ;;  %s916_s1 = sld [smem:[#allocation12_spill]] }
  0x14   : > { %s727_s30 = smov [#allocation5]   ;;  %p523_p3 = scmp.lt.s32.totalorder %s725_s15, 2 }
  0x15   : > { %p506_p1 = pneg %p813_p13  ;;  %s133_s4 = sshll.u32 %s727_s30, 4  ;;  %s134_s4 = int_to_ptr.vmem [resolvable:$true] %s133_s4 }
  0x16   : > { %s917_s2 = sld [smem:[#allocation13_spill]]  ;;  %p831_p7 = pnand %p523_p3, %p792_p5 }
  0x17   : > { %p507_p2 = pnand %p506_p1, %p41_p4  ;;  %s728_s9 = smov [#allocation7]  }
  0x18   : > { %s144_s10 = sshll.u32 %s728_s9, 4  ;;  %s158_s11 = sand.u32 1, %s721_s14   ;;  %s145_s10 = int_to_ptr.vmem [resolvable:$true] %s144_s10 }
  0x19   : > { %s131_s29 = sshll.u32 %s916_s1, 4  ;;  %s729_s17 = smov 128   ;;  %s132_s29 = int_to_ptr.hbm [resolvable:$true] %s131_s29 }
  0x1a   : > { %509 = dma.hbm_to_vmem [thread:$0]  (!%p507_p2), %s132_s29, 128, %s134_s4, [#allocation6]  }
  0x1b   : > { %s730_s19 = smov 8   ;;  %s471_s20 = sshll.u32 %s158_s11, 6 }
  0x1c   : > { %s142_s7 = sshll.u32 %s917_s2, 4  ;;  %s492_s27 = sshll.u32 %s725_s15, 6  ;;  %s143_s7 = int_to_ptr.hbm [resolvable:$true] %s142_s7 }
  0x1d   : > { %512 = dma.hbm_to_vmem [thread:$0]  (!%p507_p2), %s143_s7, 256, %s145_s10, [#allocation6], %s729_s17, %s729_s17, %s730_s19  }
  0x1e   : > { %s168_s5 = scalar_lea.hbm %s905_s0, %s492_s27  ;;  %s162_s29 = scalar_lea.vmem [#allocation2], %s471_s20 }
  0x1f   : > { %s171_s22 = sshll.u32 %s162_s29, 4  ;;  %s169_s4 = sshll.u32 %s168_s5, 4  ;;  %s172_s22 = int_to_ptr.vmem [resolvable:$true] %s171_s22  ;;  %s170_s4 = int_to_ptr.hbm [resolvable:$true] %s169_s4 }
  0x20   : > { %s159_s6 = scalar_lea.sflag [#allocation3], %s158_s11  ;;  %s625_s1 = sshra.s32 %s170_s4, 4  ;;  %s626_s1 = int_to_ptr.hbm [resolvable:$true] %s625_s1 }
  0x21   : > { %s627_s9 = scalar_lea.hbm %s626_s1, 64  ;;  %p629_p8 = pneg %p831_p7 }
  0x22   : > { %p628_p5 = scmp.ne.s32.totalorder %s626_s1, %s627_s9  ;;  %s632_s2 = scalar_lea.hbm %s905_s0, 128 }
  0x23   : > { %p633_p1 = scmp.lt.s32.totalorder %s626_s1, %s905_s0  ;;  %p634_p2 = scmp.lt.s32.totalorder %s632_s2, %s627_s9 }
  0x24   : > { %p630_p9 = pnand %p629_p8, %p628_p5 }
  0x25   : > { %p635_p3 = por %p634_p2, %p633_p1 }
  0x26   : > { %p631_p10 = pneg %p630_p9 }
  0x28   : > { %p636_p0 = pnand %p635_p3, %p631_p10 }
  0x2a   : > { %639 = shalt.err (!%p636_p0)
}
  0x2b   : > { %516 = dma.hbm_to_vmem [thread:$0]  (!%p831_p7), %s170_s4, 1024, %s172_s22, %s159_s6, %s729_s17, %s729_s17, %s730_s19  }
  0x2c   : > { %183 = sbr.rel (%p813_p13) target bundleno = 360 (0x168), region = 32  ;;  %s853_s11 = sand.u32 (!%p813_p13), 1, %s717_s13  }
  0x2d   : > { %s476_s20 = sshll.u32 (!%p813_p13), %s853_s11, 6  ;;  %s186_s30 = scalar_lea.sflag (!%p813_p13), [#allocation3], %s853_s11 }
  0x2e   : > { %s189_s5 = scalar_lea.vmem (!%p813_p13), [#allocation2], %s476_s20 }
  0x31   : > { %700 = dma.done.wait (%p798_p6), %s186_s30, 1024  }
  0x32   : > { %702 = vsyncadd (%p798_p6), %s186_s30, 4294966272 }
  0x33   : > { %704 = dma.done.wait (%p41_p4), [#allocation6], 384  }
  0x34   : > { %706 = vsyncadd (%p41_p4), [#allocation6], 4294966912  ;;  %v226_v0 = vld [vmem:[%s189_s5] sm:$0xff]  ;;  %v227_v1 = vld [vmem:[%s189_s5 + $0x8] sm:$0xff]  ;;  %vm253_vm0 = vcmask 130048   ;;  %s479_s1 = sshll.u32 %s853_s11, 5 }
  0x35   : > { %v239_v2 = vpack.c.bf16 %v226_v0, %v226_v0  ;;  %v240_v3 = vpack.c.bf16 %v227_v1, %v227_v1  ;;  %v228_v4 = vld [vmem:[%s189_s5 + $0x10] sm:$0xff]  ;;  %v229_v5 = vld [vmem:[%s189_s5 + $0x18] sm:$0xff]  ;;  %v230_v6 = vld [vmem:[%s189_s5 + $0x20] sm:$0xff]  ;;  %s222_s2 = scalar_lea.vmem [#allocation8], %s479_s1  ;;  %s493_s23 = sshll.u32 %s774_s16, 5 }
  0x36   : > { %v241_v7 = vpack.c.bf16 %v228_v4, %v228_v4  ;;  %v242_v8 = vpack.c.bf16 %v229_v5, %v229_v5  ;;  %v231_v9 = vld [vmem:[%s189_s5 + $0x28] sm:$0xff]  ;;  %v243_v10 = vpack.c.bf16 %v230_v6, %v230_v6  ;;  %v232_v11 = vld [vmem:[%s189_s5 + $0x30] sm:$0xff]  ;;  %v233_v12 = vld [vmem:[%s189_s5 + $0x38] sm:$0xff]  ;;  %s370_s17 = scalar_lea.hbm %s908_s3, %s493_s23  ;;  %s371_s19 = sshll.u32 %s222_s2, 4  ;;  %s372_s19 = int_to_ptr.vmem [resolvable:$true] %s371_s19 }
  0x37   : > { %v249_v13 = vunpack.c.l.b16 %v239_v2  ;;  %v250_v14 = vunpack.c.l.b16 %v240_v3  ;;  %v234_v15 = vld [vmem:[#allocation5] sm:$0xff]  ;;  %v244_v16 = vpack.c.bf16 %v231_v9, %v231_v9  ;;  %v245_v17 = vpack.c.bf16 %v232_v11, %v232_v11  ;;  %v236_v30 = vld [vmem:[#allocation7] sm:$0xff]  ;;  %v237_v31 = vld [vmem:[#allocation7 + $0x8] sm:$0xff]  ;;  %s373_s29 = sshll.u32 %s370_s17, 4  ;;  %s359_s22 = scalar_lea.sflag [#allocation4], %s853_s11  ;;  %s374_s29 = int_to_ptr.hbm [resolvable:$true] %s373_s29 }
  0x38   : > { %v272_v18 = vunpack.c.l.b16 %v241_v7  ;;  %v273_v19 = vunpack.c.l.b16 %v242_v8  ;;  %v291_v20 = vunpack.c.l.b16 %v243_v10  ;;  %v246_v21 = vpack.c.bf16 %v233_v12, %v233_v12  ;;  %s669_s4 = sshra.s32 %s374_s29, 4  ;;  %s675_s7 = scalar_lea.hbm %s908_s3, 64  ;;  %s670_s4 = int_to_ptr.hbm [resolvable:$true] %s669_s4 }
  0x39   : > { %v251_v22 = vpack.c.b16 %v250_v14, %v249_v13  ;;  %v292_v23 = vunpack.c.l.b16 %v244_v16  ;;  %v310_v24 = vunpack.c.l.b16 %v245_v17  ;;  %v235_v25 = vpack.c.bf16 %v234_v15, %v234_v15  ;;  %s671_s6 = scalar_lea.hbm %s670_s4, 32  ;;  %p676_p0 = scmp.lt.s32.totalorder %s670_s4, %s908_s3 }
  0x3a   : > { %v274_v26 = vpack.c.b16 %v273_v19, %v272_v18  ;;  %v311_v27 = vunpack.c.l.b16 %v246_v21  ;;  %v238_v32 = vpack.c.bf16 %v237_v31, %v236_v30  ;;  %p672_p4 = scmp.ne.s32.totalorder %s670_s4, %s671_s6  ;;  %p677_p7 = scmp.lt.s32.totalorder %s675_s7, %s671_s6 }
  0x3b   : > { %264 = vmatpush.bf16.msra.mxu1 %v251_v22  ;;  %v293_v28 = vpack.c.b16 %v292_v23, %v291_v20 }
  0x3c   : > { %v312_v29 = vpack.c.b16 %v311_v27, %v310_v24  ;;  %342 = vmatpush.bf16.msra.mxu0 %v238_v32  ;;  %p673_p6 = pnand %p672_p4, %p805_p11  ;;  %p678_p5 = por %p677_p7, %p676_p0 }
  0x3d   : > { %302 = vmatpush.bf16.msra.mxu2 %v293_v28 }
  0x3e   : > { %480 = vmatmul.msk.bf16.vlgmr.msra.gmra.mxu1 %vm253_vm0, %v235_v25  ;;  %321 = vmatpush.bf16.msra.mxu3 %v312_v29  ;;  %p674_p13 = pneg %p673_p6 }
  0x3f   : > { %283 = vmatpush.bf16.msrb.mxu1 %v274_v26 }
  0x40   : > { %482 = vmatmul.msk.bf16.vlgmr.msra.gmra.mxu2 %vm253_vm0, %v235_v25  ;;  %p679_p8 = pnand %p678_p5, %p674_p13 }
  0x41   : > { %483 = vmatmul.msk.bf16.vlgmr.msra.gmra.mxu3 %vm253_vm0, %v235_v25 }
  0x4e   : > { %481 = vmatmul.msk.bf16.vlgmr.msrb.gmra.mxu1 %vm253_vm0, %v235_v25 }
  0xbb   : > { %v266_v33 = vpop.f32.mrf.mxu1 }
  0xc3   : > { %v268_v34 = vpop.f32.mrf.mxu1  ;;  %v304_v35 = vpop.f32.mrf.mxu2 }
  0xc4   : > { %v323_v36 = vpop.f32.mrf.mxu3 }
  0xc5   : > { %v328_v42 = vpack.c.bf16 %v323_v36, %v304_v35 }
  0xcb   : > { %v285_v37 = vpop.f32.mrf.mxu1  ;;  %v306_v38 = vpop.f32.mrf.mxu2 }
  0xcc   : > { %v327_v39 = vpack.c.bf16 %v285_v37, %v266_v33  ;;  %v325_v40 = vpop.f32.mrf.mxu3 }
  0xce   : > { %484 = vmatmul.msk.bf16.vlgmr.msra.gmra.mxu0 %vm253_vm0, %v327_v39 }
  0xd3   : > { %v287_v41 = vpop.f32.mrf.mxu1 }
  0xde   : > { %485 = vmatmul.msk.bf16.gmra.mxu0 %vm253_vm0, %v328_v42 }
 0x14b   : > { %v344_v43 = vpop.f32.mrf.mxu0 }
 0x14c   : > { %354 = vst [vmem:[%s222_s2] sm:$0xff] %v344_v43 }
 0x153   : > { %v346_v44 = vpop.f32.mrf.mxu0 }
 0x154   : > { %355 = vst [vmem:[%s222_s2 + $0x8] sm:$0xff] %v346_v44 }
 0x15b   : > { %v349_v45 = vpop.f32.mrf.mxu0 }
 0x15c   : > { %356 = vst [vmem:[%s222_s2 + $0x10] sm:$0xff] %v349_v45 }
 0x163   : > { %v351_v46 = vpop.f32.mrf.mxu0 }
 0x164   : > { %357 = vst [vmem:[%s222_s2 + $0x18] sm:$0xff] %v351_v46 }
 0x165   : > { %682 = shalt.err (!%p679_p8)
}
 0x166   : > { %s731_s27 = smov 128   ;;  %s732_s11 = smov 8  }
 0x167   : > { %504 = dma.vmem_to_hbm [thread:$0]  (%p805_p11), %s372_s19, 512, %s374_s29, %s359_s22, %s731_s27, %s731_s27, %s732_s11  }
 0x168 PF: > { %s388_s20 = sand.u32 1, %s713_s12   ;;  %p919_p9 = scmp.ge.s32.totalorder %s725_s15, 2 }
 0x169   : > { %s389_s30 = scalar_lea.sflag [#allocation4], %s388_s20 }
 0x16a   : > { %p518_p10 = pnand %p919_p9, %p809_p12 }
 0x16c   : > { %p519_p1 = pneg %p518_p10 }
 0x16e   : > { %708 = dma.done.wait (%p519_p1), %s389_s30, 512  }
 0x16f   : > { %710 = vsyncadd (%p519_p1), %s389_s30, 4294966784  ;;  %p17_p2 = scmp.ge.s32.totalorder %s778_s18, 4   ;;  %s920_s12 = smov %s717_s13 }
 0x170   : > { %s921_s13 = smov %s721_s14  ;;  %s922_s14 = smov %s790_s21 }
 0x171   : > { %s923_s15 = smov %s778_s18  ;;  %19 = sbr.rel (!%p17_p2) target bundleno = 9 (0x9), region = 85 }
 0x176   :  { %395 = vsyncpa [#allocation3], 1 }
 0x177   :  { %397 = vsyncpa [#allocation3 + $0x1], 1 }
 0x178   :  { %398 = vsyncpa [#allocation6], 1 }
 0x179   :  { %399 = vsyncpa [#allocation4], 1 }
 0x17a   :  { %401 = vsyncpa [#allocation4 + $0x1], 1 }

</bundles_post_ra>
